<compile_context>
chip_gen: v7x
topology: tpu7x:2x2x1
jax: 0.10.0
libtpu: 0.0.40
codegen_flags: <defaults>
</compile_context>

<pallas_src>
import math
import functools

import jax
import jax.numpy as jnp
from jax.experimental import pallas as pl
from jax.experimental.pallas import tpu as pltpu


# ----------------------------------------------------------------------------
# Kernel 1: fused init_hidden  —  hc0 = noise @ [Wh.T | Wc.T] + [bh | bc]
# ----------------------------------------------------------------------------
def _fused_linear_kernel(noise_ref, wt_ref, b_ref, o_ref):
    y = jnp.dot(noise_ref[...], wt_ref[...],
                preferred_element_type=jnp.float32) + b_ref[...]
    o_ref[...] = y.astype(o_ref.dtype)


@jax.jit
def init_hidden_fused(noise, wt, b2d):
    """noise:[B,100], wt:[100,2H] (pre-transposed, pre-stacked), b2d:[1,2H]."""
    B = noise.shape[0]
    two_h = wt.shape[1]
    return pl.pallas_call(
        _fused_linear_kernel,
        out_shape=jax.ShapeDtypeStruct((B, two_h), jnp.float32),
        in_specs=[
            pl.BlockSpec(noise.shape, lambda: (0, 0)),
            pl.BlockSpec(wt.shape, lambda: (0, 0)),
            pl.BlockSpec(b2d.shape, lambda: (0, 0)),
        ],
        out_specs=pl.BlockSpec((B, two_h), lambda: (0, 0)),
    )(noise, wt, b2d)


# ----------------------------------------------------------------------------
# Kernel 2: time-fused LSTM.
#   per step t:  gates = [x_t | h] @ [W;U] + bias          (single MXU dot)
#                act   = where(lane in g-range, tanh, sigmoid)(gates)
#                c' = f*c + i*g ;  h' = o*tanh(c')
#   h/c carried in VMEM scratch; combined [h'|c'] written per step.
# ----------------------------------------------------------------------------
def _lstm_seq_kernel(x_ref, hc0_ref, wu_ref, b_ref, out_ref, xh_ref, c_ref,
                     *, input_size, hidden_size):
    IN, H = input_size, hidden_size
    t = pl.program_id(0)

    @pl.when(t == 0)
    def _init():
        # load the initial state into the carried scratch buffers
        xh_ref[:, IN:] = hc0_ref[:, :H]
        c_ref[...] = hc0_ref[:, H:]

    # merged [x | h] operand: x goes into lanes [0, IN), h already lives in [IN, IN+H)
    xh_ref[:, :IN] = x_ref[...]

    gates = jnp.dot(xh_ref[...].astype(wu_ref.dtype), wu_ref[...],
                    preferred_element_type=jnp.float32) + b_ref[...]   # [B, 4H]

    # full-vreg EUP passes + one lane-mask select instead of 4 narrow slices
    lane = jax.lax.broadcasted_iota(jnp.int32, gates.shape, 1)
    is_g = (lane >= 2 * H) & (lane < 3 * H)
    act = jnp.where(is_g, jnp.tanh(gates), jax.nn.sigmoid(gates))

    i = act[:, 0 * H:1 * H]
    f = act[:, 1 * H:2 * H]
    g = act[:, 2 * H:3 * H]
    o = act[:, 3 * H:4 * H]

    c_new = f * c_ref[...] + i * g
    h_new = o * jnp.tanh(c_new)

    # carry state to the next grid step
    xh_ref[:, IN:] = h_new
    c_ref[...] = c_new

    # lane-dense combined [h | c] output slab for this step
    out_ref[:, :H] = h_new.astype(out_ref.dtype)
    out_ref[:, H:] = c_new.astype(out_ref.dtype)


@jax.jit
def lstm_sequence(x_seq, hc0, wu, bias2d):
    """x_seq:[T,B,IN], hc0:[B,2H], wu:[(IN+H),4H] (f32 or bf16), bias2d:[1,4H].

    Returns hc_seq:[T,B,2H] with hc_seq[t] = concat(h_t, c_t)."""
    T, B, IN = x_seq.shape
    H = hc0.shape[1] // 2
    kernel = functools.partial(_lstm_seq_kernel, input_size=IN, hidden_size=H)
    return pl.pallas_call(
        kernel,
        out_shape=jax.ShapeDtypeStruct((T, B, 2 * H), jnp.float32),
        grid=(T,),
        in_specs=[
            pl.BlockSpec((None, B, IN), lambda t: (t, 0, 0)),   # x_t (new block per step)
            pl.BlockSpec((B, 2 * H), lambda t: (0, 0)),         # hc0  (resident)
            pl.BlockSpec((IN + H, 4 * H), lambda t: (0, 0)),    # [W;U] (resident)
            pl.BlockSpec((1, 4 * H), lambda t: (0, 0)),         # bias (resident)
        ],
        out_specs=pl.BlockSpec((None, B, 2 * H), lambda t: (t, 0, 0)),
        scratch_shapes=[
            pltpu.VMEM((B, IN + H), jnp.float32),   # merged [x | h] operand (h carried)
            pltpu.VMEM((B, H), jnp.float32),        # carried cell state
        ],
        compiler_params=pltpu.CompilerParams(
            dimension_semantics=("arbitrary",)),     # time steps are dependent
    )(x_seq, hc0, wu, bias2d)


# ----------------------------------------------------------------------------
# Module wrapper mirroring CustomLSTM (params packed once at __init__)
# ----------------------------------------------------------------------------
class CustomLSTMPallas:
    def __init__(self, input_size, hidden_size, key):
        self.input_size = input_size
        self.hidden_size = hidden_size
        H = hidden_size
        stdv = 1.0 / math.sqrt(H)
        k = jax.random.split(key, 7)
        # LSTM params, uniform(-stdv, stdv) like the PyTorch init loop
        W = jax.random.uniform(k[0], (input_size, 4 * H), jnp.float32, -stdv, stdv)
        U = jax.random.uniform(k[1], (H, 4 * H), jnp.float32, -stdv, stdv)
        bias = jax.random.uniform(k[2], (4 * H,), jnp.float32, -stdv, stdv)
        # nn.Linear(100, H) params, PyTorch default init U(-1/sqrt(100), 1/sqrt(100))
        lb = 1.0 / math.sqrt(100.0)
        n2h_w = jax.random.uniform(k[3], (H, 100), jnp.float32, -lb, lb)
        n2h_b = jax.random.uniform(k[4], (H,), jnp.float32, -lb, lb)
        n2c_w = jax.random.uniform(k[5], (H, 100), jnp.float32, -lb, lb)
        n2c_b = jax.random.uniform(k[6], (H,), jnp.float32, -lb, lb)

        # raw (PyTorch-layout) params kept for the reference check
        self.W, self.U, self.bias = W, U, bias
        self.n2h_w, self.n2h_b, self.n2c_w, self.n2c_b = n2h_w, n2h_b, n2c_w, n2c_b

        # pre-packed / pre-transposed operands (done ONCE)
        self.WU = jnp.concatenate([W, U], axis=0)                       # [(in+H), 4H]
        self.bias2d = bias.reshape(1, 4 * H)                            # [1, 4H]
        self.noise2hc_wt = jnp.concatenate([n2h_w.T, n2c_w.T], axis=1)  # [100, 2H]
        self.noise2hc_b2d = jnp.concatenate([n2h_b, n2c_b]).reshape(1, 2 * H)

        self.hc = None   # combined [h | c] state, shape [B, 2H]

    # ---- state ----
    @property
    def hidden(self):
        return self.hc[:, :self.hidden_size]

    @property
    def cell(self):
        return self.hc[:, self.hidden_size:]

    def init_hidden(self, noise):
        self.hc = init_hidden_fused(noise, self.noise2hc_wt, self.noise2hc_b2d)
        return self.hc

    # ---- stepping ----
    def forward(self, x, matmul_dtype=jnp.float32):
        """Single step (original module semantics): x:[B, input_size]."""
        hc_seq = lstm_sequence(x[None], self.hc,
                               self.WU.astype(matmul_dtype), self.bias2d)
        self.hc = hc_seq[0]
        return self.hidden, self.cell

    def forward_sequence(self, x_seq, matmul_dtype=jnp.float32):
        """Fused multi-step: x_seq:[T, B, input_size] -> (h_seq, c_seq)."""
        hc_seq = lstm_sequence(x_seq, self.hc,
                               self.WU.astype(matmul_dtype), self.bias2d)
        self.hc = hc_seq[-1]
        H = self.hidden_size
        return hc_seq[:, :, :H], hc_seq[:, :, H:]


# ----------------------------------------------------------------------------
# Pure-JAX reference
# ----------------------------------------------------------------------------
def reference_sequence(x_seq, h0, c0, W, U, bias, H):
    def step(carry, x):
        h, c = carry
        gates = x @ W + h @ U + bias
        i = jax.nn.sigmoid(gates[:, :H])
        f = jax.nn.sigmoid(gates[:, H:2 * H])
        g = jnp.tanh(gates[:, 2 * H:3 * H])
        o = jax.nn.sigmoid(gates[:, 3 * H:])
        c = f * c + i * g
        h = o * jnp.tanh(c)
        return (h, c), (h, c)

    (_, _), (hs, cs) = jax.lax.scan(step, (h0, c0), x_seq)
    return hs, cs


if __name__ == "__main__":
    key = jax.random.PRNGKey(0)
    k_param, k_noise, k_x = jax.random.split(key, 3)

    batch = 8
    input_size = 64
    hidden_size = 32
    seq_len = 8          # e.g. repeated LSTM steps inside the Generator blocks

    model = CustomLSTMPallas(input_size, hidden_size, k_param)

    noise = jax.random.normal(k_noise, (batch, 100), jnp.float32)
    x_seq = jax.random.normal(k_x, (seq_len, batch, input_size), jnp.float32)

    # --- fused init_hidden kernel ---
    hc0 = jax.block_until_ready(model.init_hidden(noise))
    h0_ref = noise @ model.n2h_w.T + model.n2h_b
    c0_ref = noise @ model.n2c_w.T + model.n2c_b
    assert jnp.allclose(hc0[:, :hidden_size], h0_ref, atol=1e-4, rtol=1e-4)
    assert jnp.allclose(hc0[:, hidden_size:], c0_ref, atol=1e-4, rtol=1e-4)

    # --- reference trajectory ---
    hs_ref, cs_ref = reference_sequence(x_seq, h0_ref, c0_ref,
                                        model.W, model.U, model.bias, hidden_size)

    # --- fused time-grid LSTM kernel, f32 MXU operands ---
    hs, cs = model.forward_sequence(x_seq)
    hs = jax.block_until_ready(hs)
    cs = jax.block_until_ready(cs)
    assert jnp.allclose(hs, hs_ref, atol=1e-4, rtol=1e-4)
    assert jnp.allclose(cs, cs_ref, atol=1e-4, rtol=1e-4)

    # --- bf16 MXU-operand variant (f32 accumulate / elementwise), loose tol ---
    model.hc = hc0
    hs_bf, cs_bf = model.forward_sequence(x_seq, matmul_dtype=jnp.bfloat16)
    hs_bf = jax.block_until_ready(hs_bf)
    cs_bf = jax.block_until_ready(cs_bf)
    assert jnp.allclose(hs_bf, hs_ref, atol=5e-2, rtol=5e-2)
    assert jnp.allclose(cs_bf, cs_ref, atol=5e-2, rtol=5e-2)

    # --- single-step forward() (original module semantics, T=1 path) ---
    model.hc = hc0
    h1, c1 = model.forward(x_seq[0])
    h1 = jax.block_until_ready(h1)
    c1 = jax.block_until_ready(c1)
    assert jnp.allclose(h1, hs_ref[0], atol=1e-4, rtol=1e-4)
    assert jnp.allclose(c1, cs_ref[0], atol=1e-4, rtol=1e-4)

    print("KERNEL_OK")
</pallas_src>

<mosaic_0001>
module attributes {stable_mosaic.version = 11 : i64} {
  func.func @_fused_linear_kernel(%arg0: memref<8x100xf32, #tpu.memory_space<vmem>>, %arg1: memref<100x64xf32, #tpu.memory_space<vmem>>, %arg2: memref<1x64xf32, #tpu.memory_space<vmem>>, %arg3: memref<8x64xf32, #tpu.memory_space<vmem>>) attributes {dimension_semantics = [], scalar_prefetch = 0 : i64, scratch_operands = 0 : i64, tpu.core_type = #tpu.core_type<tc>} {
    %c0 = arith.constant 0 : index
    %c0_0 = arith.constant 0 : index
    %0 = vector.load %arg0[%c0, %c0_0] : memref<8x100xf32, #tpu.memory_space<vmem>>, vector<8x100xf32>
    %c0_1 = arith.constant 0 : index
    %c0_2 = arith.constant 0 : index
    %1 = vector.load %arg1[%c0_1, %c0_2] : memref<100x64xf32, #tpu.memory_space<vmem>>, vector<100x64xf32>
    %cst = arith.constant dense<0.000000e+00> : vector<8x64xf32>
    %2 = tpu.matmul %0, %1, %cst {dimension_numbers = #tpu.dot_dimension_numbers<[1], [0], [0], [1], [0, 0, 1, 1], [], []>} : vector<8x100xf32>, vector<100x64xf32>, vector<8x64xf32> -> vector<8x64xf32>
    %c0_3 = arith.constant 0 : index
    %c0_4 = arith.constant 0 : index
    %3 = vector.load %arg2[%c0_3, %c0_4] : memref<1x64xf32, #tpu.memory_space<vmem>>, vector<1x64xf32>
    %4 = vector.broadcast %3 : vector<1x64xf32> to vector<8x64xf32>
    %5 = arith.addf %2, %4 : vector<8x64xf32>
    %c0_5 = arith.constant 0 : index
    %c0_6 = arith.constant 0 : index
    %6 = vector.load %arg3[%c0_5, %c0_6] : memref<8x64xf32, #tpu.memory_space<vmem>>, vector<8x64xf32>
    tpu.vector_store %arg3[%c0_5, %c0_6], %5 {strides = array<i32>} : memref<8x64xf32, #tpu.memory_space<vmem>>, vector<8x64xf32>,
    return
  }
}

</mosaic_0001>

<bundles_post_ra>
// kernel: init_hidden_fused.1
= control target key start
LH: loop header
LB: loop body
LE: loop exit
PB: predicated region body
PF: predicated region fallthrough
CT: control target
= control target key end

     0   :  { %v222_v3 = vmov 0.0|0.0   ;;  %vm223_vm0 = vmmov 0   ;;  %v224_v6 = vmov 0.0   ;;  %s303_s0 = inlined_call_operand.vmem [shape: f32[8,100], index: 0, kind: input, shape index: {}]   ;;  %s304_s1 = inlined_call_operand.vmem [shape: f32[100,64], index: 1, kind: input, shape index: {}]   ;;  %s305_s2 = inlined_call_operand.vmem [shape: f32[1,64], index: 2, kind: input, shape index: {}]   ;;  %s306_s3 = inlined_call_operand.hbm [shape: f32[8,64], index: 3, kind: output, shape index: {}]  }
   0x1   :  { %v16_v0 = vld [vmem:[%s304_s1] sm:$0xff]  ;;  %v17_v1 = vld [vmem:[%s304_s1 + $0x8] sm:$0xff]  ;;  %v18_v2 = vld [vmem:[%s304_s1 + $0x10] sm:$0xff]  ;;  %176 = vmatprep.subr.bf16.mxu0 %v222_v3  ;;  %173 = vmatprep.mubr.msk.f32.mxu0 %vm223_vm0, %v224_v6 }
   0x2   :  { %v177_v4 = vpack.c.bf16 %v17_v1, %v16_v0  ;;  %v19_v5 = vld [vmem:[%s304_s1 + $0x18] sm:$0xff]  ;;  %v20_v8 = vld [vmem:[%s304_s1 + $0x20] sm:$0xff]  ;;  %v21_v9 = vld [vmem:[%s304_s1 + $0x28] sm:$0xff] }
   0x3   :  { %v180_v7 = vpack.c.bf16 %v19_v5, %v18_v2 }
   0x4   :  { %178 = vmatpush3.bf16.msra.mxu0 %v177_v4 }
   0x5   :  { %179 = vmatprep.subr.bf16.mxu0 %v222_v3 }
   0x6   :  { %8 = vsyncpa [#allocation3], 0  ;;  %v183_v10 = vpack.c.bf16 %v21_v9, %v20_v8  ;;  %v22_v11 = vld [vmem:[%s304_s1 + $0x30] sm:$0xff]  ;;  %v23_v12 = vld [vmem:[%s304_s1 + $0x38] sm:$0xff]  ;;  %vm40_vm1 = vcmask 1043456   ;;  %vm36_vm2 = vcmask 818176  }
   0x7   :  { %v186_v13 = vpack.c.bf16 %v23_v12, %v22_v11  ;;  %v24_v14 = vld [vmem:[%s304_s1 + $0x40] sm:$0xff]  ;;  %v25_v15 = vld [vmem:[%s304_s1 + $0x48] sm:$0xff]  ;;  %v26_v17 = vld [vmem:[%s304_s1 + $0x50] sm:$0xff]  ;;  %s225_s15 = smov [#allocation2]   ;;  %vm114_vm3 = vcmask 523264  }
   0x8   :  { %181 = vmatpush3.bf16.msra.mxu0 %v180_v7  ;;  %v189_v16 = vpack.c.bf16 %v25_v15, %v24_v14  ;;  %v27_v18 = vld [vmem:[%s304_s1 + $0x58] sm:$0xff]  ;;  %v28_v20 = vld [vmem:[%s304_s1 + $0x60] sm:$0xf]  ;;  %s122_s16 = sshll.u32 %s225_s15, 4  ;;  %s123_s16 = int_to_ptr.vmem [resolvable:$true] %s122_s16 }
   0x9   :  { %182 = vmatprep.subr.bf16.mxu0 %v222_v3  ;;  %v192_v19 = vpack.c.bf16 %v27_v18, %v26_v17  ;;  %v15_v21 = vld [vmem:[%s303_s0] sm:$0xff]  ;;  %s198_s1 = scalar_lea.vmem %s123_s16, 128  ;;  %p203_p1 = scmp.lt.s32.totalorder %s123_s16, %s123_s16 }
   0xa   :  { %v130_v22 = vld [vmem:[%s305_s2] ss:$0 sm:$0xff]  ;;  %p199_p0 = scmp.ne.s32.totalorder %s123_s16, %s198_s1  ;;  %p204_p2 = scmp.lt.s32.totalorder %s198_s1, %s198_s1 }
   0xc   :  { %184 = vmatpush3.bf16.msra.mxu0 %v183_v10  ;;  %p205_p3 = por %p204_p2, %p203_p1 }
   0xd   :  { %185 = vmatprep.subr.bf16.mxu0 %v222_v3 }
   0xe   :  { %p206_p4 = pnand %p205_p3, %p199_p0 }
  0x10   :  { %187 = vmatpush3.bf16.msra.mxu0 %v186_v13 }
  0x11   :  { %188 = vmatprep.subr.bf16.mxu0 %v222_v3 }
  0x14   :  { %190 = vmatpush3.bf16.msra.mxu0 %v189_v16 }
  0x15   :  { %191 = vmatprep.subr.bf16.mxu0 %v222_v3 }
  0x18   :  { %193 = vmatpush3.bf16.msra.mxu0 %v192_v19 }
  0x19   :  { %171 = vmatprep.subr.mxu0 %v224_v6 }
  0x1c   :  { %172 = vmatpush3.msk.msra.mxu0 %vm40_vm1, %v28_v20 }
  0x1d   :  { %174 = vmatmul.mubr.msk.f32.vlgmr.msra.gmra.mrb[0].mxu0 %vm36_vm2, %v15_v21 }
  0xf0   :  { %v110_v23 = vpop.f32.mrb[0].mxu0 }
  0xf1   :  { %v111_v24 = vadd.f32 %v130_v22, %v110_v23  ;;  %v175_v25 = vpop.f32.mrb[1].mxu0 }
  0xf3   :  { %115 = vst.msk [vmem:[#allocation2] sm:$0xff] %vm114_vm3, %v111_v24 }
  0xf4   :  { %209 = shalt.err (!%p206_p4)
}
  0xf5   :  { %s210_s18 = scalar_lea.hbm %s306_s3, 128 }
  0xf6   :  { %p211_p5 = scmp.ne.s32.totalorder %s306_s3, %s210_s18  ;;  %p214_p6 = scmp.lt.u32.totalorder %s210_s18, %s306_s3 }
  0xf8   :  { %p216_p7 = pnand %p214_p6, %p211_p5 }
  0xfa   :  { %219 = shalt.err (!%p216_p7)
}
  0xfb   :  { %125 = dma.vmem_to_hbm [thread:$0]  %s123_s16, 128, %s306_s3, [#allocation3]  }
  0xfc   :  { %220 = dma.done.wait [#allocation3], 128  }
  0xfd   :  { %221 = vsyncadd [#allocation3], 4294967168 }
  0xfe   :  { %129 = vsyncpa [#allocation3], 1 }

</bundles_post_ra>
